<compile_context>
chip_gen: v6e
topology: v6e:2x2x1
jax: 0.10.0
libtpu: 0.0.40
codegen_flags: <defaults>
</compile_context>

<pallas_src>
from functools import partial

import jax
import jax.numpy as jnp
from jax.experimental import pallas as pl
from jax.experimental.pallas import tpu as pltpu


# ----------------------------------------------------------------------------
# small helpers
# ----------------------------------------------------------------------------
def _round_up(n, m):
    return ((n + m - 1) // m) * m


def _pick_tile(n_padded, candidates):
    """Largest candidate (multiple of 128) that divides n_padded; n_padded % 128 == 0."""
    for t in candidates:
        if t <= n_padded and n_padded % t == 0:
            return t
    return 128


_VMEM_LIMIT = 32 * 1024 * 1024  # safe on v5e/v6e/v7x; per-step working sets kept ~few MiB


# ----------------------------------------------------------------------------
# Kernel 1: per-mode complex channel contraction (spectral-conv hot path)
#   out[b, o, m] = sum_i ( x[b, i, m] * w[o, i, m] )      (complex multiply)
# Accumulates over Cin with broadcast-mul-add (pure VALU; no XLU reduce, no concat),
# writes a dense (Cout, MT) tile per step, real/imag stacked into one output buffer.
# ----------------------------------------------------------------------------
def _spectral_mode_kernel(xr_ref, xi_ref, wr_ref, wi_ref, out_ref):
    # xr_ref / xi_ref : (1, Cin, MT)    -- kept Fourier modes of one batch element (mode tile)
    # wr_ref / wi_ref : (Cout, Cin, MT) -- per-mode complex weights (layer `index`, mode tile)
    # out_ref         : (1, 2, Cout, MT) -- stacked [real, imag]
    xr = xr_ref[0]  # (Cin, MT)
    xi = xi_ref[0]
    cin, mt = xr.shape
    cout = wr_ref.shape[0]

    acc_r = jnp.zeros((cout, mt), jnp.float32)
    acc_i = jnp.zeros((cout, mt), jnp.float32)
    for i in range(cin):  # Cin is small & static -> unrolled, pure broadcast-FMA
        xri = xr[i:i + 1, :]          # (1, MT), broadcast across sublanes
        xii = xi[i:i + 1, :]
        wri = wr_ref[:, i, :]         # (Cout, MT)
        wii = wi_ref[:, i, :]
        acc_r = acc_r + xri * wri - xii * wii
        acc_i = acc_i + xri * wii + xii * wri

    out_ref[0, 0, :, :] = acc_r
    out_ref[0, 1, :, :] = acc_i


def spectral_mode_contract(xr, xi, wr, wi):
    """xr/xi: (B, Cin, M) f32; wr/wi: (Cout, Cin, M) f32 -> (B, 2, Cout, M) f32."""
    B, Cin, M = xr.shape
    Cout = wr.shape[0]

    # lane-dense mode axis
    Mpad = _round_up(M, 128)
    # cap per-step weight block (2 * Cout * Cin * MT * 4B) to ~4 MiB, MT <= 512
    budget = max(128, ((4 * 1024 * 1024) // max(1, 8 * Cout * Cin)) // 128 * 128)
    max_mt = min(512, budget)
    MT = _pick_tile(Mpad, tuple(t for t in (512, 384, 256, 128) if t <= max_mt))

    if Mpad != M:
        pad = [(0, 0), (0, 0), (0, Mpad - M)]
        xr = jnp.pad(xr, pad)
        xi = jnp.pad(xi, pad)
        wr = jnp.pad(wr, pad)
        wi = jnp.pad(wi, pad)

    out = pl.pallas_call(
        _spectral_mode_kernel,
        out_shape=jax.ShapeDtypeStruct((B, 2, Cout, Mpad), jnp.float32),
        grid=(B, Mpad // MT),
        in_specs=[
            pl.BlockSpec((1, Cin, MT), lambda b, m: (b, 0, m)),
            pl.BlockSpec((1, Cin, MT), lambda b, m: (b, 0, m)),
            pl.BlockSpec((Cout, Cin, MT), lambda b, m: (0, 0, m)),
            pl.BlockSpec((Cout, Cin, MT), lambda b, m: (0, 0, m)),
        ],
        out_specs=pl.BlockSpec((1, 2, Cout, MT), lambda b, m: (b, 0, 0, m)),
        compiler_params=pltpu.CompilerParams(
            dimension_semantics=("parallel", "parallel"),
            vmem_limit_bytes=_VMEM_LIMIT,
        ),
    )(xr, xi, wr, wi)

    return out[..., :M] if Mpad != M else out


# ----------------------------------------------------------------------------
# Kernel 2: 1x1-conv skip connection + residual add + GELU, tiled over HW
#   y[b, o, p] = gelu( x_fno[b, o, p] + sum_i W_skip[o, i] * x[b, i, p] )
# Accepts bf16 activations (bandwidth-bound kernel); casts to f32 in-kernel.
# ----------------------------------------------------------------------------
def _gelu_tanh(y):
    # TODO(synk): PyTorch F.gelu defaults to the exact erf form; tanh approximation used in-kernel.
    c = jnp.float32(0.7978845608028654)  # sqrt(2/pi)
    return 0.5 * y * (1.0 + jnp.tanh(c * (y + 0.044715 * y * y * y)))


def _skip_add_gelu_kernel(x_ref, w_ref, fno_ref, o_ref):
    # x_ref   : (1, Cin, T)     (f32 or bf16)
    # w_ref   : (Cout, Cin)
    # fno_ref : (1, Cout, T)
    # o_ref   : (1, Cout, T)    f32
    x = x_ref[0].astype(jnp.float32)                              # (Cin, T)
    w = w_ref[...].astype(jnp.float32)                            # (Cout, Cin)
    fno = fno_ref[0].astype(jnp.float32)                          # (Cout, T)
    skip = jnp.dot(w, x, preferred_element_type=jnp.float32)      # (Cout, T)
    o_ref[0] = _gelu_tanh(fno + skip).astype(o_ref.dtype)


def skip_add_gelu(x_flat, w_skip, fno_flat):
    """x_flat: (B, Cin, HW), fno_flat: (B, Cout, HW) -> (B, Cout, HW) f32."""
    B, Cin, HW = x_flat.shape
    Cout = w_skip.shape[0]

    HWpad = _round_up(HW, 128)
    T = _pick_tile(HWpad, (2048, 1024, 512, 256, 128))
    if HWpad != HW:
        pad = [(0, 0), (0, 0), (0, HWpad - HW)]
        x_flat = jnp.pad(x_flat, pad)
        fno_flat = jnp.pad(fno_flat, pad)

    out = pl.pallas_call(
        _skip_add_gelu_kernel,
        out_shape=jax.ShapeDtypeStruct((B, Cout, HWpad), jnp.float32),
        grid=(B, HWpad // T),
        in_specs=[
            pl.BlockSpec((1, Cin, T), lambda b, t: (b, 0, t)),
            pl.BlockSpec((Cout, Cin), lambda b, t: (0, 0)),
            pl.BlockSpec((1, Cout, T), lambda b, t: (b, 0, t)),
        ],
        out_specs=pl.BlockSpec((1, Cout, T), lambda b, t: (b, 0, t)),
        compiler_params=pltpu.CompilerParams(
            dimension_semantics=("parallel", "parallel"),
            vmem_limit_bytes=_VMEM_LIMIT,
        ),
    )(x_flat, w_skip, fno_flat)

    return out[..., :HW] if HWpad != HW else out


# ----------------------------------------------------------------------------
# FNO block forward for one layer `index` (the shared main module's forward)
# ----------------------------------------------------------------------------
def fno_block_forward(x, params, index, n_modes, compute_dtype=jnp.bfloat16):
    B, Cin, H, W = x.shape
    m1, m2 = n_modes
    assert H >= 2 * m1 and (W // 2 + 1) >= m2, "n_modes too large for input resolution"

    wr = params["spec_wr"][index]     # (Cout, Cin, 2*m1, m2)
    wi = params["spec_wi"][index]
    w_skip = params["skip_w"][index]  # (Cout, Cin)
    Cout = wr.shape[0]
    M = 2 * m1 * m2

    # TODO(synk): FFT / inverse FFT have no Pallas TPU primitive; kept in plain JAX.
    x_ft = jnp.fft.rfft2(x.astype(jnp.float32), axes=(-2, -1))    # (B, Cin, H, W//2+1)
    x_modes = jnp.concatenate(
        [x_ft[:, :, :m1, :m2], x_ft[:, :, H - m1:, :m2]], axis=2
    )                                                             # (B, Cin, 2*m1, m2)
    xr = jnp.real(x_modes).reshape(B, Cin, M).astype(jnp.float32)
    xi = jnp.imag(x_modes).reshape(B, Cin, M).astype(jnp.float32)

    out_stack = spectral_mode_contract(
        xr, xi, wr.reshape(Cout, Cin, M), wi.reshape(Cout, Cin, M)
    )                                                             # (B, 2, Cout, M)
    out_modes = jax.lax.complex(out_stack[:, 0], out_stack[:, 1]).reshape(B, Cout, 2 * m1, m2)

    # TODO(synk): padded-spectrum scatter + irfft2 stay in plain JAX (no Pallas FFT).
    Wf = W // 2 + 1
    out_ft = jnp.zeros((B, Cout, H, Wf), dtype=jnp.complex64)
    out_ft = out_ft.at[:, :, :m1, :m2].set(out_modes[:, :, :m1])
    out_ft = out_ft.at[:, :, H - m1:, :m2].set(out_modes[:, :, m1:])
    x_fno = jnp.fft.irfft2(out_ft, s=(H, W), axes=(-2, -1)).astype(jnp.float32)

    y = skip_add_gelu(
        x.reshape(B, Cin, H * W).astype(compute_dtype),
        w_skip.astype(compute_dtype),
        x_fno.reshape(B, Cout, H * W).astype(compute_dtype),
    )
    return y.reshape(B, Cout, H, W)


# ----------------------------------------------------------------------------
# Module wrappers mirroring the PyTorch structure (shared parameters)
# ----------------------------------------------------------------------------
class FNOBlocks:
    """The shared 'main module': a stack of jointly-parameterized FNO blocks."""

    def __init__(self, params, n_modes, compute_dtype=jnp.bfloat16):
        self.params = params
        self.n_modes = n_modes
        self.compute_dtype = compute_dtype

    def forward(self, x, index, compute_dtype=None):
        dt = self.compute_dtype if compute_dtype is None else compute_dtype
        return fno_block_forward(x, self.params, index, self.n_modes, dt)


class SubModule:
    """Pallas port of SubModule: view onto one layer of the shared main module."""

    def __init__(self, main_module, indices):
        self.main_module = main_module
        self.indices = indices

    def forward(self, x, **kwargs):
        return self.main_module.forward(x, self.indices, **kwargs)

    __call__ = forward


# ----------------------------------------------------------------------------
# Deterministic parameter init + pure-JAX reference for validation
# ----------------------------------------------------------------------------
def init_params(key, n_layers, cin, cout, m1, m2):
    k1, k2, k3 = jax.random.split(key, 3)
    scale = 1.0 / (cin * cout)
    return dict(
        spec_wr=scale * jax.random.normal(k1, (n_layers, cout, cin, 2 * m1, m2), jnp.float32),
        spec_wi=scale * jax.random.normal(k2, (n_layers, cout, cin, 2 * m1, m2), jnp.float32),
        skip_w=jax.random.normal(k3, (n_layers, cout, cin), jnp.float32) / jnp.sqrt(cin),
    )


def reference_forward(x, params, index, n_modes):
    B, Cin, H, W = x.shape
    m1, m2 = n_modes
    wr = params["spec_wr"][index]
    wi = params["spec_wi"][index]
    w_skip = params["skip_w"][index]
    Cout = wr.shape[0]
    wc = wr + 1j * wi  # (Cout, Cin, 2*m1, m2)

    x_ft = jnp.fft.rfft2(x, axes=(-2, -1))
    x_modes = jnp.concatenate([x_ft[:, :, :m1, :m2], x_ft[:, :, H - m1:, :m2]], axis=2)
    out_modes = jnp.einsum("bikl,oikl->bokl", x_modes, wc)
    out_ft = jnp.zeros((B, Cout, H, W // 2 + 1), dtype=jnp.complex64)
    out_ft = out_ft.at[:, :, :m1, :m2].set(out_modes[:, :, :m1])
    out_ft = out_ft.at[:, :, H - m1:, :m2].set(out_modes[:, :, m1:])
    x_fno = jnp.fft.irfft2(out_ft, s=(H, W), axes=(-2, -1))

    skip = jnp.einsum("oi,bihw->bohw", w_skip, x)
    y = x_fno + skip
    c = 0.7978845608028654
    return 0.5 * y * (1.0 + jnp.tanh(c * (y + 0.044715 * y ** 3)))


if __name__ == "__main__":
    key = jax.random.PRNGKey(0)
    kx, kp = jax.random.split(key)

    B, C, H, W = 2, 4, 16, 16
    m1 = m2 = 4
    n_layers = 2
    layer_index = 0

    x = jax.random.normal(kx, (B, C, H, W), jnp.float32)
    params = init_params(kp, n_layers, C, C, m1, m2)

    main_module = FNOBlocks(params, (m1, m2))
    sub_module = SubModule(main_module, indices=layer_index)

    ref = reference_forward(x, params, layer_index, (m1, m2))

    # exact (f32 activations on the skip path)
    out_f32 = jax.block_until_ready(sub_module(x, compute_dtype=jnp.float32))
    assert out_f32.shape == (B, C, H, W), out_f32.shape
    assert jnp.allclose(out_f32, ref, atol=1e-4, rtol=1e-4), float(jnp.max(jnp.abs(out_f32 - ref)))

    # default bf16 skip-path activations (bandwidth optimization); looser tolerance
    out_bf16 = jax.block_until_ready(sub_module(x))
    assert out_bf16.shape == (B, C, H, W), out_bf16.shape
    assert jnp.allclose(out_bf16, ref, atol=5e-2, rtol=5e-2), float(jnp.max(jnp.abs(out_bf16 - ref)))

    print("KERNEL_OK")
</pallas_src>

<mosaic_0001>
module attributes {stable_mosaic.version = 11 : i64} {
  func.func @_spectral_mode_kernel(%arg0: i32, %arg1: i32, %arg2: memref<1x4x128xf32, #tpu.memory_space<vmem>>, %arg3: memref<1x4x128xf32, #tpu.memory_space<vmem>>, %arg4: memref<4x4x128xf32, #tpu.memory_space<vmem>>, %arg5: memref<4x4x128xf32, #tpu.memory_space<vmem>>, %arg6: memref<1x2x4x128xf32, #tpu.memory_space<vmem>>) attributes {dimension_semantics = [#tpu.dimension_semantics<parallel>, #tpu.dimension_semantics<parallel>], iteration_bounds = array<i64: 2, 1>, scalar_prefetch = 0 : i64, scratch_operands = 0 : i64, tpu.core_type = #tpu.core_type<tc>, window_params = [{transform_indices = @transform_0, window_bounds = array<i64: 1, 4, 128>}, {transform_indices = @transform_1, window_bounds = array<i64: 1, 4, 128>}, {transform_indices = @transform_2, window_bounds = array<i64: 4, 4, 128>}, {transform_indices = @transform_3, window_bounds = array<i64: 4, 4, 128>}, {transform_indices = @transform_4, window_bounds = array<i64: 1, 2, 4, 128>}]} {
    %c0 = arith.constant 0 : index
    %c0_0 = arith.constant 0 : index
    %c0_1 = arith.constant 0 : index
    %0 = vector.load %arg2[%c0, %c0_0, %c0_1] : memref<1x4x128xf32, #tpu.memory_space<vmem>>, vector<1x4x128xf32>
    %1 = vector.shape_cast %0 : vector<1x4x128xf32> to vector<4x128xf32>
    %c0_2 = arith.constant 0 : index
    %c0_3 = arith.constant 0 : index
    %c0_4 = arith.constant 0 : index
    %2 = vector.load %arg3[%c0_2, %c0_3, %c0_4] : memref<1x4x128xf32, #tpu.memory_space<vmem>>, vector<1x4x128xf32>
    %3 = vector.shape_cast %2 : vector<1x4x128xf32> to vector<4x128xf32>
    %cst = arith.constant 0.000000e+00 : f32
    %4 = vector.broadcast %cst : f32 to vector<4x128xf32>
    %cst_5 = arith.constant 0.000000e+00 : f32
    %5 = vector.broadcast %cst_5 : f32 to vector<4x128xf32>
    %6 = vector.extract_strided_slice %1 {offsets = [0, 0], sizes = [1, 128], strides = [1, 1]} : vector<4x128xf32> to vector<1x128xf32>
    %7 = vector.extract_strided_slice %3 {offsets = [0, 0], sizes = [1, 128], strides = [1, 1]} : vector<4x128xf32> to vector<1x128xf32>
    %c0_6 = arith.constant 0 : index
    %c0_7 = arith.constant 0 : index
    %c0_8 = arith.constant 0 : index
    %8 = vector.load %arg4[%c0_6, %c0_7, %c0_8] : memref<4x4x128xf32, #tpu.memory_space<vmem>>, vector<4x1x128xf32>
    %9 = vector.shape_cast %8 : vector<4x1x128xf32> to vector<4x128xf32>
    %c0_9 = arith.constant 0 : index
    %c0_10 = arith.constant 0 : index
    %c0_11 = arith.constant 0 : index
    %10 = vector.load %arg5[%c0_9, %c0_10, %c0_11] : memref<4x4x128xf32, #tpu.memory_space<vmem>>, vector<4x1x128xf32>
    %11 = vector.shape_cast %10 : vector<4x1x128xf32> to vector<4x128xf32>
    %12 = vector.broadcast %6 : vector<1x128xf32> to vector<4x128xf32>
    %13 = arith.mulf %12, %9 : vector<4x128xf32>
    %14 = arith.addf %4, %13 : vector<4x128xf32>
    %15 = vector.broadcast %7 : vector<1x128xf32> to vector<4x128xf32>
    %16 = arith.mulf %15, %11 : vector<4x128xf32>
    %17 = arith.subf %14, %16 : vector<4x128xf32>
    %18 = vector.broadcast %6 : vector<1x128xf32> to vector<4x128xf32>
    %19 = arith.mulf %18, %11 : vector<4x128xf32>
    %20 = arith.addf %5, %19 : vector<4x128xf32>
    %21 = vector.broadcast %7 : vector<1x128xf32> to vector<4x128xf32>
    %22 = arith.mulf %21, %9 : vector<4x128xf32>
    %23 = arith.addf %20, %22 : vector<4x128xf32>
    %24 = vector.extract_strided_slice %1 {offsets = [1, 0], sizes = [1, 128], strides = [1, 1]} : vector<4x128xf32> to vector<1x128xf32>
    %25 = vector.extract_strided_slice %3 {offsets = [1, 0], sizes = [1, 128], strides = [1, 1]} : vector<4x128xf32> to vector<1x128xf32>
    %c0_12 = arith.constant 0 : index
    %c1 = arith.constant 1 : index
    %c0_13 = arith.constant 0 : index
    %26 = vector.load %arg4[%c0_12, %c1, %c0_13] : memref<4x4x128xf32, #tpu.memory_space<vmem>>, vector<4x1x128xf32>
    %27 = vector.shape_cast %26 : vector<4x1x128xf32> to vector<4x128xf32>
    %c0_14 = arith.constant 0 : index
    %c1_15 = arith.constant 1 : index
    %c0_16 = arith.constant 0 : index
    %28 = vector.load %arg5[%c0_14, %c1_15, %c0_16] : memref<4x4x128xf32, #tpu.memory_space<vmem>>, vector<4x1x128xf32>
    %29 = vector.shape_cast %28 : vector<4x1x128xf32> to vector<4x128xf32>
    %30 = vector.broadcast %24 : vector<1x128xf32> to vector<4x128xf32>
    %31 = arith.mulf %30, %27 : vector<4x128xf32>
    %32 = arith.addf %17, %31 : vector<4x128xf32>
    %33 = vector.broadcast %25 : vector<1x128xf32> to vector<4x128xf32>
    %34 = arith.mulf %33, %29 : vector<4x128xf32>
    %35 = arith.subf %32, %34 : vector<4x128xf32>
    %36 = vector.broadcast %24 : vector<1x128xf32> to vector<4x128xf32>
    %37 = arith.mulf %36, %29 : vector<4x128xf32>
    %38 = arith.addf %23, %37 : vector<4x128xf32>
    %39 = vector.broadcast %25 : vector<1x128xf32> to vector<4x128xf32>
    %40 = arith.mulf %39, %27 : vector<4x128xf32>
    %41 = arith.addf %38, %40 : vector<4x128xf32>
    %42 = vector.extract_strided_slice %1 {offsets = [2, 0], sizes = [1, 128], strides = [1, 1]} : vector<4x128xf32> to vector<1x128xf32>
    %43 = vector.extract_strided_slice %3 {offsets = [2, 0], sizes = [1, 128], strides = [1, 1]} : vector<4x128xf32> to vector<1x128xf32>
    %c0_17 = arith.constant 0 : index
    %c2 = arith.constant 2 : index
    %c0_18 = arith.constant 0 : index
    %44 = vector.load %arg4[%c0_17, %c2, %c0_18] : memref<4x4x128xf32, #tpu.memory_space<vmem>>, vector<4x1x128xf32>
    %45 = vector.shape_cast %44 : vector<4x1x128xf32> to vector<4x128xf32>
    %c0_19 = arith.constant 0 : index
    %c2_20 = arith.constant 2 : index
    %c0_21 = arith.constant 0 : index
    %46 = vector.load %arg5[%c0_19, %c2_20, %c0_21] : memref<4x4x128xf32, #tpu.memory_space<vmem>>, vector<4x1x128xf32>
    %47 = vector.shape_cast %46 : vector<4x1x128xf32> to vector<4x128xf32>
    %48 = vector.broadcast %42 : vector<1x128xf32> to vector<4x128xf32>
    %49 = arith.mulf %48, %45 : vector<4x128xf32>
    %50 = arith.addf %35, %49 : vector<4x128xf32>
    %51 = vector.broadcast %43 : vector<1x128xf32> to vector<4x128xf32>
    %52 = arith.mulf %51, %47 : vector<4x128xf32>
    %53 = arith.subf %50, %52 : vector<4x128xf32>
    %54 = vector.broadcast %42 : vector<1x128xf32> to vector<4x128xf32>
    %55 = arith.mulf %54, %47 : vector<4x128xf32>
    %56 = arith.addf %41, %55 : vector<4x128xf32>
    %57 = vector.broadcast %43 : vector<1x128xf32> to vector<4x128xf32>
    %58 = arith.mulf %57, %45 : vector<4x128xf32>
    %59 = arith.addf %56, %58 : vector<4x128xf32>
    %60 = vector.extract_strided_slice %1 {offsets = [3, 0], sizes = [1, 128], strides = [1, 1]} : vector<4x128xf32> to vector<1x128xf32>
    %61 = vector.extract_strided_slice %3 {offsets = [3, 0], sizes = [1, 128], strides = [1, 1]} : vector<4x128xf32> to vector<1x128xf32>
    %c0_22 = arith.constant 0 : index
    %c3 = arith.constant 3 : index
    %c0_23 = arith.constant 0 : index
    %62 = vector.load %arg4[%c0_22, %c3, %c0_23] : memref<4x4x128xf32, #tpu.memory_space<vmem>>, vector<4x1x128xf32>
    %63 = vector.shape_cast %62 : vector<4x1x128xf32> to vector<4x128xf32>
    %c0_24 = arith.constant 0 : index
    %c3_25 = arith.constant 3 : index
    %c0_26 = arith.constant 0 : index
    %64 = vector.load %arg5[%c0_24, %c3_25, %c0_26] : memref<4x4x128xf32, #tpu.memory_space<vmem>>, vector<4x1x128xf32>
    %65 = vector.shape_cast %64 : vector<4x1x128xf32> to vector<4x128xf32>
    %66 = vector.broadcast %60 : vector<1x128xf32> to vector<4x128xf32>
    %67 = arith.mulf %66, %63 : vector<4x128xf32>
    %68 = arith.addf %53, %67 : vector<4x128xf32>
    %69 = vector.broadcast %61 : vector<1x128xf32> to vector<4x128xf32>
    %70 = arith.mulf %69, %65 : vector<4x128xf32>
    %71 = arith.subf %68, %70 : vector<4x128xf32>
    %72 = vector.broadcast %60 : vector<1x128xf32> to vector<4x128xf32>
    %73 = arith.mulf %72, %65 : vector<4x128xf32>
    %74 = arith.addf %59, %73 : vector<4x128xf32>
    %75 = vector.broadcast %61 : vector<1x128xf32> to vector<4x128xf32>
    %76 = arith.mulf %75, %63 : vector<4x128xf32>
    %77 = arith.addf %74, %76 : vector<4x128xf32>
    %c0_27 = arith.constant 0 : index
    %c0_28 = arith.constant 0 : index
    %c0_29 = arith.constant 0 : index
    %c0_30 = arith.constant 0 : index
    %78 = vector.load %arg6[%c0_27, %c0_28, %c0_29, %c0_30] : memref<1x2x4x128xf32, #tpu.memory_space<vmem>>, vector<1x1x4x128xf32>
    %79 = vector.shape_cast %78 : vector<1x1x4x128xf32> to vector<4x128xf32>
    %80 = vector.shape_cast %71 : vector<4x128xf32> to vector<1x1x4x128xf32>
    tpu.vector_store %arg6[%c0_27, %c0_28, %c0_29, %c0_30], %80 {strides = array<i32>} : memref<1x2x4x128xf32, #tpu.memory_space<vmem>>, vector<1x1x4x128xf32>,
    %c0_31 = arith.constant 0 : index
    %c1_32 = arith.constant 1 : index
    %c0_33 = arith.constant 0 : index
    %c0_34 = arith.constant 0 : index
    %81 = vector.load %arg6[%c0_31, %c1_32, %c0_33, %c0_34] : memref<1x2x4x128xf32, #tpu.memory_space<vmem>>, vector<1x1x4x128xf32>
    %82 = vector.shape_cast %81 : vector<1x1x4x128xf32> to vector<4x128xf32>
    %83 = vector.shape_cast %77 : vector<4x128xf32> to vector<1x1x4x128xf32>
    tpu.vector_store %arg6[%c0_31, %c1_32, %c0_33, %c0_34], %83 {strides = array<i32>} : memref<1x2x4x128xf32, #tpu.memory_space<vmem>>, vector<1x1x4x128xf32>,
    return
  }
  func.func @transform_0(%arg0: i32, %arg1: i32) -> (i32, i32, i32) {
    %c0_i32 = arith.constant 0 : i32
    %c0_i32_0 = arith.constant 0 : i32
    return %arg0, %c0_i32, %arg1 : i32, i32, i32
  }
  func.func @transform_1(%arg0: i32, %arg1: i32) -> (i32, i32, i32) {
    %c0_i32 = arith.constant 0 : i32
    %c0_i32_0 = arith.constant 0 : i32
    return %arg0, %c0_i32, %arg1 : i32, i32, i32
  }
  func.func @transform_2(%arg0: i32, %arg1: i32) -> (i32, i32, i32) {
    %c0_i32 = arith.constant 0 : i32
    %c0_i32_0 = arith.constant 0 : i32
    %c0_i32_1 = arith.constant 0 : i32
    return %c0_i32, %c0_i32_0, %arg1 : i32, i32, i32
  }
  func.func @transform_3(%arg0: i32, %arg1: i32) -> (i32, i32, i32) {
    %c0_i32 = arith.constant 0 : i32
    %c0_i32_0 = arith.constant 0 : i32
    %c0_i32_1 = arith.constant 0 : i32
    return %c0_i32, %c0_i32_0, %arg1 : i32, i32, i32
  }
  func.func @transform_4(%arg0: i32, %arg1: i32) -> (i32, i32, i32, i32) {
    %c0_i32 = arith.constant 0 : i32
    %c0_i32_0 = arith.constant 0 : i32
    %c0_i32_1 = arith.constant 0 : i32
    return %arg0, %c0_i32, %c0_i32_0, %arg1 : i32, i32, i32, i32
  }
}

</mosaic_0001>

<bundles_post_ra>
// kernel: tpu_custom_call.1
= control target key start
LH: loop header
LB: loop body
LE: loop exit
PB: predicated region body
PF: predicated region fallthrough
CT: control target
= control target key end

     0   :  { %s1267_s0 = inlined_call_operand.hbm [shape: f32[2,4,128], index: 0, kind: input, shape index: {}]   ;;  %s1268_s1 = inlined_call_operand.hbm [shape: f32[2,4,128], index: 1, kind: input, shape index: {}]   ;;  %s1269_s2 = inlined_call_operand.hbm [shape: f32[4,4,128], index: 2, kind: input, shape index: {}]   ;;  %s1270_s3 = inlined_call_operand.hbm [shape: f32[4,4,128], index: 3, kind: input, shape index: {}]   ;;  %s1271_s4 = inlined_call_operand.hbm [shape: f32[2,2,4,128], index: 4, kind: output, shape index: {}]  }
   0x1   :  { %1273 = sst [smem:[#allocation16_spill]] %s1267_s0 }
   0x2   :  { %1274 = sst [smem:[#allocation17_spill]] %s1268_s1 }
   0x3   :  { %9 = vsyncpa [#allocation3], 0 }
   0x4   :  { %11 = vsyncpa [#allocation3 + $0x1], 0 }
   0x5   :  { %12 = vsyncpa [#allocation6], 0 }
   0x6   :  { %14 = vsyncpa [#allocation6 + $0x1], 0 }
   0x7   :  { %15 = vsyncpa [#allocation9], 0 }
   0x8   :  { %16 = vsyncpa [#allocation4], 0 }
   0x9   :  { %18 = vsyncpa [#allocation4 + $0x1], 0  ;;  %s1002_s15 = smov 0   ;;  %s1004_s16 = smov 0  }
   0xa   :  { %s1006_s17 = smov 0   ;;  %s1008_s18 = smov 0  }
   0xb   :  { %s1010_s19 = smov 0   ;;  %s1012_s20 = smov 0  }
   0xc LB: > { %s1033_s21 = sadd.s32 4294967295, %s966_s20   ;;  %s652_s22 = sadd.s32 4294967294, %s966_s20   ;;  %s966_s20 = sphi %s1012_s20, %s24_s20   ;;  %s962_s19 = sphi %s1010_s19, %s1294_s19   ;;  %s958_s18 = sphi %s1008_s18, %s1293_s18   ;;  %s954_s17 = sphi %s1006_s17, %s1292_s17   ;;  %s950_s16 = sphi %s1004_s16, %s1291_s16   ;;  %s946_s15 = sphi %s1002_s15, %s1290_s15  }
   0xd   : > { %p58_p0 = scmp.ne.s32.totalorder %s950_s16, %s946_s15  ;;  %p1272_p1 = scmp.eq.s32.totalorder %s1033_s21, 0 }
   0xe   : > { %p170_p3 = scmp.eq.s32.totalorder %s652_s22, 1  ;;  %p653_p5 = scmp.ge.s32.totalorder %s966_s20, 1 }
   0xf   : > { %p1042_p4 = por %p1272_p1, %p58_p0  ;;  %p177_p7 = scmp.lt.s32.totalorder %s966_s20, 3 }
  0x10   : > { %p1047_p6 = por %p170_p3, %p58_p0  ;;  %s968_s26 = smov [#allocation7]  }
  0x11   : > { %p1052_p8 = pnand %p653_p5, %p177_p7  ;;  %s191_s27 = sshll.u32 %s968_s26, 4  ;;  %s192_s27 = int_to_ptr.vmem [resolvable:$true] %s191_s27 }
  0x12   : > { %s1276_s24 = scalar_select %p1047_p6, 1, 0 }
  0x13   : > { %p688_p9 = pneg %p1052_p8  ;;  %s969_s29 = smov [#allocation8]  }
  0x14   : > { %s206_s30 = sshll.u32 %s969_s29, 4  ;;  %s777_s5 = scalar_lea.vmem %s192_s27, 256  ;;  %s207_s30 = int_to_ptr.vmem [resolvable:$true] %s206_s30 }
  0x15   : > { %p1061_p11 = pnand %p688_p9, %p1272_p1  ;;  %p778_p13 = scmp.ne.s32.totalorder %s192_s27, %s777_s5 }
  0x16   : > { %p785_p5 = scmp.lt.s32.totalorder %s192_s27, %s192_s27  ;;  %p786_p7 = scmp.lt.s32.totalorder %s777_s5, %s777_s5 }
  0x17   : > { %p768_p12 = pneg %p1061_p11 }
  0x18   : > { %p787_p10 = por %p786_p7, %p785_p5 }
  0x19   : > { %p780_p0 = pnand %p778_p13, %p768_p12 }
  0x1b   : > { %p781_p3 = pneg %p780_p0 }
  0x1d   : > { %p788_p9 = pnand %p787_p10, %p781_p3 }
  0x1f   : > { %791 = shalt.err (!%p788_p9)
}
  0x20   : > { %s970_s6 = smov 64   ;;  %s971_s7 = smov 4  }
  0x21   : > { %691 = dma.hbm_to_vmem [thread:$0]  (!%p1061_p11), %s1269_s2, 256, %s192_s27, [#allocation6], %s970_s6, %s970_s6, %s971_s7  }
  0x22   : > { %s803_s10 = scalar_lea.vmem %s207_s30, 256  ;;  %p811_p2 = scmp.lt.s32.totalorder %s207_s30, %s207_s30 }
  0x23   : > { %p804_p1 = scmp.ne.s32.totalorder %s207_s30, %s803_s10  ;;  %p812_p6 = scmp.lt.s32.totalorder %s803_s10, %s803_s10 }
  0x25   : > { %p806_p13 = pnand %p804_p1, %p768_p12  ;;  %p813_p5 = por %p812_p6, %p811_p2 }
  0x27   : > { %p807_p0 = pneg %p806_p13 }
  0x29   : > { %p814_p10 = pnand %p813_p5, %p807_p0 }
  0x2b   : > { %817 = shalt.err (!%p814_p10)
}
  0x2c   : > { %694 = dma.hbm_to_vmem [thread:$0]  (!%p1061_p11), %s1270_s3, 256, %s207_s30, [#allocation9], %s970_s6, %s970_s6, %s971_s7  }
  0x2d   : > { %s36_s13 = sadd.s32 1, %s962_s19  ;;  %s45_s14 = sadd.s32 1, %s954_s17 }
  0x2e   : > { %p38_p1 = scmp.ge.s32.totalorder %s36_s13, 2  ;;  %p52_p2 = scmp.ne.s32.totalorder %s954_s17, %s950_s16 }
  0x2f   : > { %p53_p6 = scmp.eq.s32.totalorder %s966_s20, 0  ;;  %p708_p12 = scmp.lt.s32.totalorder %s966_s20, 2 }
  0x30   : > { %s1296_s13 = smov (%p38_p1, %s36_s13), 0  ;;  %p1279_p7 = scmp.eq.s32.totalorder %s1033_s21, 1 }
  0x31   : > { %p54_p3 = por %p53_p6, %p52_p2  ;;  %s40_s26 = ssub.s32 %s962_s19, %s1296_s13 }
  0x32   : > { %p1093_p9 = por %p1279_p7, %p52_p2  ;;  %s220_s27 = sand.u32 1, %s954_s17  }
  0x33   : > { %p43_p13 = scmp.eq.s32.totalorder %s40_s26, 0  ;;  %s657_s28 = sshll.u32 %s220_s27, 2 }
  0x34   : > { %s658_s29 = sshll.u32 %s962_s19, 6  ;;  %s1281_s0 = sld [smem:[#allocation16_spill]] }
  0x35   : > { %s1102_s30 = scalar_select %p43_p13, %s954_s17, %s45_s14  }
  0x36   : > { %s224_s8 = scalar_lea.vmem [#allocation2], %s657_s28  ;;  %p1109_p11 = pnand %p708_p12, %p54_p3 }
  0x37   : > { %s232_s9 = sshll.u32 %s224_s8, 4  ;;  %s1283_s1 = sld [smem:[#allocation17_spill]]  ;;  %s233_s9 = int_to_ptr.vmem [resolvable:$true] %s232_s9 }
  0x38   : > { %s221_s14 = scalar_lea.sflag [#allocation3], %s220_s27  ;;  %p820_p0 = pneg %p1109_p11 }
  0x39   : > { %s831_s5 = scalar_lea.vmem %s233_s9, 64  ;;  %s972_s6 = smov [#allocation2]  }
  0x3a   : > { %s230_s7 = scalar_lea.hbm %s1281_s0, %s658_s29  ;;  %p832_p5 = scmp.ne.s32.totalorder %s233_s9, %s831_s5 }
  0x3b   : > { %s836_s8 = sshll.u32 %s972_s6, 4  ;;  %s837_s8 = int_to_ptr.vmem [resolvable:$false] %s836_s8 }
  0x3c   : > { %p834_p10 = pnand %p832_p5, %p820_p0  ;;  %s838_s0 = scalar_lea.vmem %s837_s8, 128 }
  0x3d   : > { %s1116_s26 = scalar_lea.hbm %s1283_s1, %s658_s29  ;;  %p839_p2 = scmp.lt.s32.totalorder %s233_s9, %s837_s8 }
  0x3e   : > { %p835_p1 = pneg %p834_p10  ;;  %p840_p6 = scmp.lt.s32.totalorder %s838_s0, %s831_s5 }
  0x40   : > { %p841_p12 = por %p840_p6, %p839_p2 }
  0x42   : > { %p842_p3 = pnand %p841_p12, %p835_p1 }
  0x44   : > { %845 = shalt.err (!%p842_p3)
}
  0x45   : > { %698 = dma.hbm_to_vmem [thread:$0]  (!%p1109_p11), %s230_s7, 64, %s233_s9, %s221_s14  }
  0x46   : > { %s239_s27 = sand.u32 1, %s966_s20   ;;  %s243_s29 = scalar_lea.vmem [#allocation5], %s657_s28 }
  0x47   : > { %s251_s11 = sshll.u32 %s243_s29, 4  ;;  %s240_s12 = scalar_lea.sflag [#allocation6], %s239_s27  ;;  %s252_s11 = int_to_ptr.vmem [resolvable:$true] %s251_s11 }
  0x48   : > { %s859_s1 = scalar_lea.vmem %s252_s11, 64  ;;  %s973_s0 = smov [#allocation5]  }
  0x49   : > { %p860_p7 = scmp.ne.s32.totalorder %s252_s11, %s859_s1  ;;  %s864_s5 = sshll.u32 %s973_s0, 4  ;;  %s865_s5 = int_to_ptr.vmem [resolvable:$false] %s864_s5 }
  0x4a   : > { %s866_s6 = scalar_lea.vmem %s865_s5, 128  ;;  %p867_p10 = scmp.lt.s32.totalorder %s252_s11, %s865_s5 }
  0x4b   : > { %p862_p13 = pnand %p860_p7, %p820_p0  ;;  %p868_p1 = scmp.lt.s32.totalorder %s866_s6, %s859_s1 }
  0x4d   : > { %p863_p5 = pneg %p862_p13  ;;  %p869_p2 = por %p868_p1, %p867_p10 }
  0x4f   : > { %p870_p6 = pnand %p869_p2, %p863_p5 }
  0x51   : > { %873 = shalt.err (!%p870_p6)
}
  0x52   : > { %701 = dma.hbm_to_vmem [thread:$0]  (!%p1109_p11), %s1116_s26, 64, %s252_s11, %s240_s12  }
  0x53   : > { %260 = sbr.rel (%p1052_p8) target bundleno = 148 (0x94), region = 36  ;;  %s1135_s28 = sand.u32 (!%p1052_p8), 1, %s950_s16  }
  0x54   : > { %s662_s7 = sshll.u32 (!%p1052_p8), %s1135_s28, 2  ;;  %s263_s9 = scalar_lea.sflag (!%p1052_p8), [#allocation3], %s1135_s28 }
  0x55   : > { %s266_s14 = scalar_lea.vmem (!%p1052_p8), [#allocation2], %s662_s7 }
  0x58   : > { %925 = dma.done.wait (%p1042_p4), %s263_s9, 64  }
  0x59   : > { %927 = vsyncadd (%p1042_p4), %s263_s9, 4294967232  ;;  %s271_s1 = sand.u32 1, %s1033_s21   ;;  %s275_s25 = scalar_lea.vmem [#allocation5], %s662_s7 }
  0x5a   : > { %s272_s10 = scalar_lea.sflag [#allocation6], %s271_s1 }
  0x5b   : > { %929 = dma.done.wait (%p1042_p4), %s272_s10, 64  }
  0x5c   : > { %931 = vsyncadd (%p1042_p4), %s272_s10, 4294967232  ;;  %p1284_p8 = scmp.eq.s32.totalorder %s1033_s21, 0 }
  0x5e   : > { %933 = dma.done.wait (%p1284_p8), [#allocation6], 256   ;;  %p1285_p11 = pmov %p1284_p8 }
  0x5f   : > { %p1286_p0 = pmov %p1284_p8 }
  0x60   : > { %935 = vsyncadd (%p1285_p11), [#allocation6], 4294967040 }
  0x61   : > { %937 = dma.done.wait (%p1286_p0), [#allocation9], 256   ;;  %p1287_p12 = pmov %p1286_p0 }
  0x62   : > { %v323_v0 = vlaneseq  ;;  %vm332_vm0 = vcmask 1041409   ;;  %vm335_vm1 = vcmask 1042434   ;;  %vm338_vm2 = vcmask 1043459   ;;  %v313_v6 = vld [vmem:[%s266_s14] sm:$0xf]  ;;  %s666_s21 = sshll.u32 %s1135_s28, 3 }
  0x63   : > { %939 = vsyncadd (%p1287_p12), [#allocation9], 4294967040  ;;  %v314_v7 = vld [vmem:[%s275_s25] sm:$0xf]  ;;  %v315_v8 = vld [vmem:[#allocation7] sm:$0x1] }
  0x64   : > { %v324_v1 = vshrl.u32 %v323_v0, 7  ;;  %v316_v9 = vld [vmem:[#allocation7 + $0x4] sm:$0x1]  ;;  %v317_v10 = vld [vmem:[#allocation7 + $0x8] sm:$0x1]  ;;  %s312_s23 = scalar_lea.vmem [#allocation10], %s666_s21 }
  0x65   : > { %v318_v11 = vld [vmem:[#allocation7 + $0xc] sm:$0x1]  ;;  %v319_v12 = vld [vmem:[#allocation8] sm:$0x1]  ;;  %v320_v13 = vld [vmem:[#allocation8 + $0x4] sm:$0x1] }
  0x66   : > { %v325_v2 = vsub.s32 0, %v324_v1  ;;  %v374_v3 = vsub.s32 1, %v324_v1  ;;  %v420_v4 = vsub.s32 2, %v324_v1  ;;  %v466_v5 = vsub.s32 3, %v324_v1  ;;  %v321_v14 = vld [vmem:[#allocation8 + $0x8] sm:$0x1] }
  0x67   : > { %v322_v17 = vld [vmem:[#allocation8 + $0xc] sm:$0x1]  ;;  %v331_v18 = vrot.slane %v316_v9, 7  ;;  %v334_v19 = vrot.slane %v317_v10, 6  ;;  %v337_v20 = vrot.slane %v318_v11, 5  ;;  %v351_v21 = vrot.slane %v320_v13, 7 }
  0x68   : > { %v326_v15 = vrot.slane %v313_v6, %v325_v2  ;;  %v1156_v16 = vrot.slane %v314_v7, %v325_v2  ;;  %v353_v22 = vrot.slane %v321_v14, 6  ;;  %v355_v23 = vrot.slane %v322_v17, 5  ;;  %v365_v24 = vld [vmem:[#allocation7 + $0x5] sm:$0x1]  ;;  %v364_v29 = vld [vmem:[#allocation7 + $0x1] sm:$0x1] }
  0x69   : > { %v1158_v25 = vrot.slane %v313_v6, %v374_v3  ;;  %v1160_v26 = vrot.slane %v314_v7, %v374_v3  ;;  %v333_v27 = vsel %vm332_vm0, %v331_v18, %v315_v8  ;;  %v352_v28 = vsel %vm332_vm0, %v351_v21, %v319_v12  ;;  %v366_v30 = vld [vmem:[#allocation7 + $0x9] sm:$0x1]  ;;  %v367_v31 = vld [vmem:[#allocation7 + $0xd] sm:$0x1]  ;;  %v369_v36 = vld [vmem:[#allocation8 + $0x5] sm:$0x1] }
  0x6a   : > { %v1164_v32 = vrot.slane %v313_v6, %v420_v4  ;;  %v1166_v33 = vrot.slane %v314_v7, %v420_v4  ;;  %v336_v34 = vsel %vm335_vm1, %v334_v19, %v333_v27  ;;  %v354_v35 = vsel %vm335_vm1, %v353_v22, %v352_v28  ;;  %v370_v37 = vld [vmem:[#allocation8 + $0x9] sm:$0x1]  ;;  %v371_v38 = vld [vmem:[#allocation8 + $0xd] sm:$0x1]  ;;  %v368_v43 = vld [vmem:[#allocation8 + $0x1] sm:$0x1] }
  0x6b   : > { %v1170_v39 = vrot.slane %v313_v6, %v466_v5  ;;  %v1172_v40 = vrot.slane %v314_v7, %v466_v5  ;;  %v1175_v41 = vsel %vm338_vm2, %v337_v20, %v336_v34  ;;  %v356_v42 = vsel %vm338_vm2, %v355_v23, %v354_v35  ;;  %v411_v46 = vld [vmem:[#allocation7 + $0x6] sm:$0x1]  ;;  %v412_v51 = vld [vmem:[#allocation7 + $0xa] sm:$0x1]  ;;  %v413_v52 = vld [vmem:[#allocation7 + $0xe] sm:$0x1] }
  0x6c   : > { %v380_v44 = vrot.slane %v365_v24, 7  ;;  %v382_v45 = vrot.slane %v366_v30, 6  ;;  %v341_v47 = vmul.f32 %v1175_v41, %v326_v15  ;;  %v358_v48 = vmul.f32 %v356_v42, %v1156_v16  ;;  %v410_v56 = vld [vmem:[#allocation7 + $0x2] sm:$0x1]  ;;  %v415_v57 = vld [vmem:[#allocation8 + $0x6] sm:$0x1] }
  0x6d   : > { %v384_v49 = vrot.slane %v367_v31, 5  ;;  %v397_v50 = vrot.slane %v369_v36, 7  ;;  %v399_v54 = vrot.slane %v370_v37, 6  ;;  %v401_v55 = vrot.slane %v371_v38, 5  ;;  %v416_v62 = vld [vmem:[#allocation8 + $0xa] sm:$0x1] }
  0x6e   : > { %v381_v53 = vsel %vm332_vm0, %v380_v44, %v364_v29  ;;  %v360_v58 = vmul.f32 %v356_v42, %v326_v15  ;;  %v359_v59 = vsub.f32 %v341_v47, %v358_v48  ;;  %v417_v63 = vld [vmem:[#allocation8 + $0xe] sm:$0x1]  ;;  %v426_v0 = vrot.slane %v411_v46, 7  ;;  %v414_v3 = vld [vmem:[#allocation8 + $0x2] sm:$0x1]  ;;  %s520_s26 = sshll.u32 %s312_s23, 4  ;;  %s1214_s26 = int_to_ptr.vmem [resolvable:$true] %s520_s26 }
  0x6f   : > { %v383_v60 = vsel %vm335_vm1, %v382_v45, %v381_v53  ;;  %v398_v61 = vsel %vm332_vm0, %v397_v50, %v368_v43  ;;  %v428_v4 = vrot.slane %v412_v51, 6  ;;  %v430_v5 = vrot.slane %v413_v52, 5  ;;  %v457_v6 = vld [vmem:[#allocation7 + $0x7] sm:$0x1]  ;;  %v458_v11 = vld [vmem:[#allocation7 + $0xb] sm:$0x1] }
  0x70   : > { %v385_v1 = vsel %vm338_vm2, %v384_v49, %v383_v60  ;;  %v400_v2 = vsel %vm335_vm1, %v399_v54, %v398_v61  ;;  %v427_v9 = vsel %vm332_vm0, %v426_v0, %v410_v56  ;;  %v443_v10 = vrot.slane %v415_v57, 7  ;;  %v459_v12 = vld [vmem:[#allocation7 + $0xf] sm:$0x1]  ;;  %v456_v18 = vld [vmem:[#allocation7 + $0x3] sm:$0x1]  ;;  %s673_s8 = sshll.u32 %s958_s18, 7 }
  0x71   : > { %v387_v7 = vmul.f32 %v385_v1, %v1158_v25  ;;  %v402_v8 = vsel %vm338_vm2, %v401_v55, %v400_v2  ;;  %v429_v14 = vsel %vm335_vm1, %v428_v4, %v427_v9  ;;  %v445_v15 = vrot.slane %v416_v62, 6  ;;  %v461_v19 = vld [vmem:[#allocation8 + $0x7] sm:$0x1]  ;;  %v462_v23 = vld [vmem:[#allocation8 + $0xb] sm:$0x1]  ;;  %s1219_s11 = scalar_lea.hbm %s1271_s4, %s673_s8  ;;  %s506_s12 = scalar_lea.sflag [#allocation4], %s1135_s28 }
  0x72   : > { %v404_v13 = vmul.f32 %v402_v8, %v1160_v26  ;;  %v447_v17 = vrot.slane %v417_v63, 5  ;;  %v431_v21 = vsel %vm338_vm2, %v430_v5, %v429_v14  ;;  %v444_v22 = vsel %vm332_vm0, %v443_v10, %v414_v3  ;;  %v463_v24 = vld [vmem:[#allocation8 + $0xf] sm:$0x1]  ;;  %v460_v30 = vld [vmem:[#allocation8 + $0x3] sm:$0x1]  ;;  %s874_s0 = scalar_lea.vmem %s1214_s26, 128 }
  0x73   : > { %v388_v20 = vadd.f32 %v387_v7, %v359_v59  ;;  %v472_v27 = vrot.slane %v457_v6, 7  ;;  %v433_v28 = vmul.f32 %v431_v21, %v1164_v32  ;;  %v446_v29 = vsel %vm335_vm1, %v445_v15, %v444_v22  ;;  %p875_p4 = scmp.ne.s32.totalorder %s1214_s26, %s874_s0  ;;  %s974_s18 = smov [#allocation10]  }
  0x74   : > { %v474_v31 = vrot.slane %v458_v11, 6  ;;  %v476_v34 = vrot.slane %v459_v12, 5  ;;  %v448_v36 = vsel %vm338_vm2, %v447_v17, %v446_v29  ;;  %v489_v38 = vrot.slane %v461_v19, 7  ;;  %s878_s5 = sshll.u32 %s974_s18, 4  ;;  %s879_s5 = int_to_ptr.vmem [resolvable:$false] %s878_s5 }
  0x75   : > { %v405_v35 = vsub.f32 %v388_v20, %v404_v13  ;;  %v473_v37 = vsel %vm332_vm0, %v472_v27, %v456_v18  ;;  %v450_v42 = vmul.f32 %v448_v36, %v1166_v33  ;;  %v491_v44 = vrot.slane %v462_v23, 6  ;;  %p876_p3 = pnand %p875_p4, %p1093_p9  ;;  %s880_s6 = scalar_lea.vmem %s879_s5, 256 }
  0x76   : > { %v475_v43 = vsel %vm335_vm1, %v474_v31, %v473_v37  ;;  %v493_v45 = vrot.slane %v463_v24, 5  ;;  %v490_v48 = vsel %vm332_vm0, %v489_v38, %v460_v30  ;;  %v362_v49 = vmul.f32 %v1156_v16, %v1175_v41  ;;  %p881_p13 = scmp.lt.s32.totalorder %s1214_s26, %s879_s5  ;;  %p882_p5 = scmp.lt.s32.totalorder %s880_s6, %s874_s0 }
  0x77   : > { %v434_v46 = vadd.f32 %v433_v28, %v405_v35  ;;  %v477_v47 = vsel %vm338_vm2, %v476_v34, %v475_v43  ;;  %v492_v51 = vsel %vm335_vm1, %v491_v44, %v490_v48  ;;  %v406_v52 = vmul.f32 %v402_v8, %v1158_v25  ;;  %p877_p7 = pneg %p876_p3 }
  0x78   : > { %v479_v50 = vmul.f32 %v477_v47, %v1170_v39  ;;  %v494_v54 = vsel %vm338_vm2, %v493_v45, %v492_v51  ;;  %v363_v55 = vadd.f32 %v362_v49, %v360_v58  ;;  %v408_v56 = vmul.f32 %v1160_v26, %v385_v1  ;;  %p883_p10 = por %p882_p5, %p881_p13 }
  0x79   : > { %v451_v53 = vsub.f32 %v434_v46, %v450_v42  ;;  %v496_v57 = vmul.f32 %v494_v54, %v1172_v40  ;;  %v452_v16 = vmul.f32 %v448_v36, %v1164_v32  ;;  %v454_v62 = vmul.f32 %v1166_v33, %v431_v21 }
  0x7a   : > { %v407_v60 = vadd.f32 %v406_v52, %v363_v55  ;;  %v498_v58 = vmul.f32 %v494_v54, %v1170_v39  ;;  %v500_v26 = vmul.f32 %v1172_v40, %v477_v47  ;;  %p884_p1 = pnand %p883_p10, %p877_p7 }
  0x7b   : > { %v480_v59 = vadd.f32 %v479_v50, %v451_v53 }
  0x7c   : > { %v409_v61 = vadd.f32 %v408_v56, %v407_v60 }
  0x7d   : > { %v497_v41 = vsub.f32 %v480_v59, %v496_v57 }
  0x7e   : > { %v453_v25 = vadd.f32 %v452_v16, %v409_v61 }
  0x7f   : > { %502 = vst [vmem:[%s312_s23] sm:$0xf] %v497_v41 }
  0x80   : > { %v455_v63 = vadd.f32 %v454_v62, %v453_v25 }
  0x82   : > { %v499_v0 = vadd.f32 %v498_v58, %v455_v63 }
  0x84   : > { %v501_v32 = vadd.f32 %v500_v26, %v499_v0 }
  0x86   : > { %667 = vst [vmem:[%s312_s23 + $0x4] sm:$0xf] %v501_v32 }
  0x87   : > { %887 = shalt.err (!%p884_p1)
}
  0x88   : > { %s888_s7 = scalar_lea.hbm %s1219_s11, 128  ;;  %s892_s1 = scalar_lea.hbm %s1271_s4, 256 }
  0x89   : > { %p889_p2 = scmp.ne.s32.totalorder %s1219_s11, %s888_s7  ;;  %p893_p11 = scmp.lt.s32.totalorder %s1219_s11, %s1271_s4 }
  0x8a   : > { %p894_p0 = scmp.lt.s32.totalorder %s892_s1, %s888_s7 }
  0x8b   : > { %p890_p6 = pnand %p889_p2, %p1093_p9 }
  0x8c   : > { %p895_p12 = por %p894_p0, %p893_p11 }
  0x8d   : > { %p891_p8 = pneg %p890_p6 }
  0x8f   : > { %p896_p4 = pnand %p895_p12, %p891_p8 }
  0x91   : > { %899 = shalt.err (!%p896_p4)
}
  0x92   : > { %s975_s21 = smov 64   ;;  %s976_s23 = smov 4  }
  0x93   : > { %686 = dma.vmem_to_hbm [thread:$0]  (%p1093_p9), %s1214_s26, 128, %s1219_s11, %s506_s12, %s975_s21, %s975_s21, %s976_s23  }
  0x94 PF: > { %s535_s8 = sand.u32 1, %s946_s15   ;;  %p1288_p3 = scmp.ne.s32.totalorder %s1276_s24, 0 }
  0x95   : > { %p1289_p7 = scmp.ge.s32.totalorder %s966_s20, 2  ;;  %s536_s27 = scalar_lea.sflag [#allocation4], %s535_s8 }
  0x97   : > { %p703_p13 = pnand %p1289_p7, %p1288_p3 }
  0x99   : > { %p704_p5 = pneg %p703_p13 }
  0x9b   : > { %941 = dma.done.wait (%p704_p5), %s536_s27, 128  }
  0x9c   : > { %943 = vsyncadd (%p704_p5), %s536_s27, 4294967168  ;;  %s24_s20 = sadd.s32 1, %s966_s20   ;;  %s1290_s15 = smov %s950_s16 }
  0x9d   : > { %p21_p10 = scmp.ge.s32.totalorder %s24_s20, 4   ;;  %s1291_s16 = smov %s954_s17 }
  0x9e   : > { %s1292_s17 = smov %s1102_s30  ;;  %s1293_s18 = smov %s962_s19 }
  0x9f   : > { %s1294_s19 = smov %s1296_s13  ;;  %23 = sbr.rel (!%p21_p10) target bundleno = 12 (0xc), region = 105 }
  0xa4   :  { %541 = vsyncpa [#allocation3], 1 }
  0xa5   :  { %543 = vsyncpa [#allocation3 + $0x1], 1 }
  0xa6   :  { %544 = vsyncpa [#allocation6], 1 }
  0xa7   :  { %546 = vsyncpa [#allocation6 + $0x1], 1 }
  0xa8   :  { %547 = vsyncpa [#allocation9], 1 }
  0xa9   :  { %548 = vsyncpa [#allocation4], 1 }
  0xaa   :  { %550 = vsyncpa [#allocation4 + $0x1], 1 }

</bundles_post_ra>
